<compile_context>
chip_gen: v5e
topology: v5e:2x2
jax: 0.10.0
libtpu: 0.0.40
codegen_flags: <defaults>
</compile_context>

<pallas_src>
import functools

import numpy as np
import jax
import jax.numpy as jnp
from jax.experimental import pallas as pl
from jax.experimental.pallas import tpu as pltpu

NUM_BITS = 10
LATENT = 16
HIDDEN = 64
BLK = 8                       # 2 ** wavelet_levels
FEAT = 3 * BLK * BLK          # 192 = 144 (s1 s2d4) + 36 (s2 s2d2) + 12 (s3)


def _round_up(x, m):
    return ((x + m - 1) // m) * m


# ---------------------------------------------------------------------------
# Constant Haar block matrix (built once, NumPy, exact values):
#   feat_row = pixel_block_row @ HM        (pixel layout: c*64 + y*8 + x)
# HM is orthogonal, so the full inverse DWT + feature-split is  @ HM.T.
# ---------------------------------------------------------------------------
def _haar_level_np(x):
    a = x[..., 0::2, 0::2]
    b = x[..., 0::2, 1::2]
    c = x[..., 1::2, 0::2]
    d = x[..., 1::2, 1::2]
    ll = 0.5 * (a + b + c + d)
    lh = 0.5 * (a - b + c - d)
    hl = 0.5 * (a + b - c - d)
    hh = 0.5 * (a - b - c + d)
    return ll, lh, hl, hh


def _space_to_depth_np(x, f):
    B, C, H, W = x.shape
    hb, wb = H // f, W // f
    x = x.reshape(B, C, hb, f, wb, f).transpose(0, 2, 4, 1, 3, 5)
    return x.reshape(B, hb, wb, C * f * f)


def build_haar_block_matrix():
    basis = np.eye(FEAT, dtype=np.float64).reshape(FEAT, 3, BLK, BLK)
    ll1, lh1, hl1, hh1 = _haar_level_np(basis)
    ll2, lh2, hl2, hh2 = _haar_level_np(ll1)
    ll3, lh3, hl3, hh3 = _haar_level_np(ll2)
    s1 = np.concatenate([lh1, hl1, hh1], axis=1)          # (FEAT, 9, 4, 4)
    s2 = np.concatenate([lh2, hl2, hh2], axis=1)          # (FEAT, 9, 2, 2)
    s3 = np.concatenate([ll3, lh3, hl3, hh3], axis=1)     # (FEAT, 12, 1, 1)
    f1 = _space_to_depth_np(s1, 4).reshape(FEAT, 144)
    f2 = _space_to_depth_np(s2, 2).reshape(FEAT, 36)
    f3 = s3.transpose(0, 2, 3, 1).reshape(FEAT, 12)
    hm = np.concatenate([f1, f2, f3], axis=1).astype(np.float32)
    assert np.allclose(hm @ hm.T, np.eye(FEAT), atol=1e-6)  # orthonormal
    return hm


# ---------------------------------------------------------------------------
# Fused kernel: per 8x8x3 block (one row of the tile):
#   DWT(matmul) -> enc MLP -> tanh -> quantize -> dec MLP -> IDWT(matmul) -> tanh
# ---------------------------------------------------------------------------
def _wae_fused_kernel(px_ref, hm_ref, hmt_ref,
                      ew1_ref, eb1_ref, ew2_ref, eb2_ref,
                      dw1_ref, db1_ref, dw2_ref, db2_ref,
                      out_ref, y_ref):
    # 3-level Haar DWT + space-to-depth feature assembly (exact, one matmul).
    feat = jnp.dot(px_ref[...], hm_ref[...], preferred_element_type=jnp.float32)

    # Encoder MLP.
    h = jnp.dot(feat, ew1_ref[...], preferred_element_type=jnp.float32) + eb1_ref[...]
    h = jnp.maximum(h, 0.0)
    y = jnp.tanh(jnp.dot(h, ew2_ref[...], preferred_element_type=jnp.float32) + eb2_ref[...])

    # Eval-mode quantization round-trip (truncating int cast, as in reference).
    scale = float(2 ** NUM_BITS)
    yq = ((0.5 * y + 0.5) * scale).astype(jnp.int32)
    ydq = 2.0 * (yq.astype(jnp.float32) / scale) - 1.0
    y_ref[...] = ydq

    # Decoder MLP.
    g = jnp.dot(ydq, dw1_ref[...], preferred_element_type=jnp.float32) + db1_ref[...]
    g = jnp.maximum(g, 0.0)
    dec = jnp.dot(g, dw2_ref[...], preferred_element_type=jnp.float32) + db2_ref[...]

    # Inverse 3-level Haar (transpose of forward) + final tanh.
    out_ref[...] = jnp.tanh(jnp.dot(dec, hmt_ref[...], preferred_element_type=jnp.float32))


# ---------------------------------------------------------------------------
# Wrapper
# ---------------------------------------------------------------------------
def wavelet_autoencoder_forward(img, params):
    N, C, H, W = img.shape
    assert C == 3 and H % BLK == 0 and W % BLK == 0
    hb, wb = H // BLK, W // BLK
    M = N * hb * wb

    # Single relayout: (N,3,H,W) -> (M, 192) blocks, inner order (c, y, x).
    px = img.reshape(N, C, hb, BLK, wb, BLK).transpose(0, 2, 4, 1, 3, 5)
    px = px.reshape(M, FEAT)

    # M-tiling: multiple of 8 sublanes, up to 512 rows per tile.
    tm = min(512, _round_up(M, 8))
    m_pad = _round_up(M, tm)
    if m_pad != M:
        px = jnp.pad(px, ((0, m_pad - M), (0, 0)))
    grid = (m_pad // tm,)

    row_spec = lambda shape: pl.BlockSpec(shape, lambda i: (i, 0))
    w_spec = lambda shape: pl.BlockSpec(shape, lambda i: (0, 0))  # VMEM-resident

    out_px, ydq = pl.pallas_call(
        _wae_fused_kernel,
        out_shape=(jax.ShapeDtypeStruct((m_pad, FEAT), jnp.float32),
                   jax.ShapeDtypeStruct((m_pad, LATENT), jnp.float32)),
        grid=grid,
        in_specs=[
            row_spec((tm, FEAT)),
            w_spec((FEAT, FEAT)), w_spec((FEAT, FEAT)),
            w_spec((FEAT, HIDDEN)), w_spec((1, HIDDEN)),
            w_spec((HIDDEN, LATENT)), w_spec((1, LATENT)),
            w_spec((LATENT, HIDDEN)), w_spec((1, HIDDEN)),
            w_spec((HIDDEN, FEAT)), w_spec((1, FEAT)),
        ],
        out_specs=(row_spec((tm, FEAT)), row_spec((tm, LATENT))),
        compiler_params=pltpu.CompilerParams(
            dimension_semantics=("parallel",),
            vmem_limit_bytes=32 * 1024 * 1024),
    )(px, params["haar"], params["haar_t"],
      params["enc_w1"], params["enc_b1"], params["enc_w2"], params["enc_b2"],
      params["dec_w1"], params["dec_b1"], params["dec_w2"], params["dec_b2"])

    # Single relayout back: (M, 192) -> (N, 3, H, W).
    out = out_px[:M].reshape(N, hb, wb, C, BLK, BLK)
    out = out.transpose(0, 3, 1, 4, 2, 5).reshape(N, C, H, W)
    y = ydq[:M].reshape(N, hb, wb, LATENT).transpose(0, 3, 1, 2)
    return out, y


def init_params(key):
    ks = jax.random.split(key, 4)

    def lin(k, fan_in, fan_out):
        kw, kb = jax.random.split(k)
        bound = 1.0 / float(fan_in) ** 0.5
        w = jax.random.uniform(kw, (fan_in, fan_out), jnp.float32, -bound, bound)
        b = jax.random.uniform(kb, (1, fan_out), jnp.float32, -bound, bound)
        return w, b

    enc_w1, enc_b1 = lin(ks[0], FEAT, HIDDEN)
    enc_w2, enc_b2 = lin(ks[1], HIDDEN, LATENT)
    dec_w1, dec_b1 = lin(ks[2], LATENT, HIDDEN)
    dec_w2, dec_b2 = lin(ks[3], HIDDEN, FEAT)
    hm = build_haar_block_matrix()
    return dict(enc_w1=enc_w1, enc_b1=enc_b1, enc_w2=enc_w2, enc_b2=enc_b2,
                dec_w1=dec_w1, dec_b1=dec_b1, dec_w2=dec_w2, dec_b2=dec_b2,
                haar=jnp.asarray(hm), haar_t=jnp.asarray(hm.T))


if __name__ == "__main__":
    key = jax.random.PRNGKey(0)
    k_img, k_par = jax.random.split(key)
    img = jnp.tanh(jax.random.normal(k_img, (2, 3, 16, 16), jnp.float32))
    params = init_params(k_par)

    fwd = jax.jit(wavelet_autoencoder_forward)
    out, y = fwd(img, params)
    jax.block_until_ready(out)
    jax.block_until_ready(y)

    assert out.shape == (2, 3, 16, 16) and out.dtype == jnp.float32
    assert y.shape == (2, LATENT, 2, 2) and y.dtype == jnp.float32
    assert bool(jnp.all(jnp.isfinite(out))) and bool(jnp.all(jnp.isfinite(y)))
    print("KERNEL_OK")
</pallas_src>

<mosaic_0001>
module attributes {stable_mosaic.version = 11 : i64} {
  func.func @_wae_fused_kernel(%arg0: i32, %arg1: memref<8x192xf32, #tpu.memory_space<vmem>>, %arg2: memref<192x192xf32, #tpu.memory_space<vmem>>, %arg3: memref<192x192xf32, #tpu.memory_space<vmem>>, %arg4: memref<192x64xf32, #tpu.memory_space<vmem>>, %arg5: memref<1x64xf32, #tpu.memory_space<vmem>>, %arg6: memref<64x16xf32, #tpu.memory_space<vmem>>, %arg7: memref<1x16xf32, #tpu.memory_space<vmem>>, %arg8: memref<16x64xf32, #tpu.memory_space<vmem>>, %arg9: memref<1x64xf32, #tpu.memory_space<vmem>>, %arg10: memref<64x192xf32, #tpu.memory_space<vmem>>, %arg11: memref<1x192xf32, #tpu.memory_space<vmem>>, %arg12: memref<8x192xf32, #tpu.memory_space<vmem>>, %arg13: memref<8x16xf32, #tpu.memory_space<vmem>>) attributes {dimension_semantics = [#tpu.dimension_semantics<parallel>], iteration_bounds = array<i64: 1>, scalar_prefetch = 0 : i64, scratch_operands = 0 : i64, tpu.core_type = #tpu.core_type<tc>, window_params = [{transform_indices = @transform_0, window_bounds = array<i64: 8, 192>}, {pipeline_mode = #tpu.pipeline_mode<synchronous>, transform_indices = @transform_1, window_bounds = array<i64: 192, 192>}, {pipeline_mode = #tpu.pipeline_mode<synchronous>, transform_indices = @transform_2, window_bounds = array<i64: 192, 192>}, {pipeline_mode = #tpu.pipeline_mode<synchronous>, transform_indices = @transform_3, window_bounds = array<i64: 192, 64>}, {pipeline_mode = #tpu.pipeline_mode<synchronous>, transform_indices = @transform_4, window_bounds = array<i64: 1, 64>}, {pipeline_mode = #tpu.pipeline_mode<synchronous>, transform_indices = @transform_5, window_bounds = array<i64: 64, 16>}, {pipeline_mode = #tpu.pipeline_mode<synchronous>, transform_indices = @transform_6, window_bounds = array<i64: 1, 16>}, {pipeline_mode = #tpu.pipeline_mode<synchronous>, transform_indices = @transform_7, window_bounds = array<i64: 16, 64>}, {pipeline_mode = #tpu.pipeline_mode<synchronous>, transform_indices = @transform_8, window_bounds = array<i64: 1, 64>}, {pipeline_mode = #tpu.pipeline_mode<synchronous>, transform_indices = @transform_9, window_bounds = array<i64: 64, 192>}, {pipeline_mode = #tpu.pipeline_mode<synchronous>, transform_indices = @transform_10, window_bounds = array<i64: 1, 192>}, {transform_indices = @transform_11, window_bounds = array<i64: 8, 192>}, {transform_indices = @transform_12, window_bounds = array<i64: 8, 16>}]} {
    %c0 = arith.constant 0 : index
    %c0_0 = arith.constant 0 : index
    %0 = vector.load %arg1[%c0, %c0_0] : memref<8x192xf32, #tpu.memory_space<vmem>>, vector<8x192xf32>
    %c0_1 = arith.constant 0 : index
    %c0_2 = arith.constant 0 : index
    %1 = vector.load %arg2[%c0_1, %c0_2] : memref<192x192xf32, #tpu.memory_space<vmem>>, vector<192x192xf32>
    %cst = arith.constant dense<0.000000e+00> : vector<8x192xf32>
    %2 = tpu.matmul %0, %1, %cst {dimension_numbers = #tpu.dot_dimension_numbers<[1], [0], [0], [1], [0, 0, 1, 1], [], []>} : vector<8x192xf32>, vector<192x192xf32>, vector<8x192xf32> -> vector<8x192xf32>
    %c0_3 = arith.constant 0 : index
    %c0_4 = arith.constant 0 : index
    %3 = vector.load %arg4[%c0_3, %c0_4] : memref<192x64xf32, #tpu.memory_space<vmem>>, vector<192x64xf32>
    %cst_5 = arith.constant dense<0.000000e+00> : vector<8x64xf32>
    %4 = tpu.matmul %2, %3, %cst_5 {dimension_numbers = #tpu.dot_dimension_numbers<[1], [0], [0], [1], [0, 0, 1, 1], [], []>} : vector<8x192xf32>, vector<192x64xf32>, vector<8x64xf32> -> vector<8x64xf32>
    %c0_6 = arith.constant 0 : index
    %c0_7 = arith.constant 0 : index
    %5 = vector.load %arg5[%c0_6, %c0_7] : memref<1x64xf32, #tpu.memory_space<vmem>>, vector<1x64xf32>
    %6 = vector.broadcast %5 : vector<1x64xf32> to vector<8x64xf32>
    %7 = arith.addf %4, %6 : vector<8x64xf32>
    %cst_8 = arith.constant 0.000000e+00 : f32
    %8 = vector.broadcast %cst_8 : f32 to vector<8x64xf32>
    %9 = arith.maximumf %7, %8 : vector<8x64xf32>
    %c0_9 = arith.constant 0 : index
    %c0_10 = arith.constant 0 : index
    %10 = vector.load %arg6[%c0_9, %c0_10] : memref<64x16xf32, #tpu.memory_space<vmem>>, vector<64x16xf32>
    %cst_11 = arith.constant dense<0.000000e+00> : vector<8x16xf32>
    %11 = tpu.matmul %9, %10, %cst_11 {dimension_numbers = #tpu.dot_dimension_numbers<[1], [0], [0], [1], [0, 0, 1, 1], [], []>} : vector<8x64xf32>, vector<64x16xf32>, vector<8x16xf32> -> vector<8x16xf32>
    %c0_12 = arith.constant 0 : index
    %c0_13 = arith.constant 0 : index
    %12 = vector.load %arg7[%c0_12, %c0_13] : memref<1x16xf32, #tpu.memory_space<vmem>>, vector<1x16xf32>
    %13 = vector.broadcast %12 : vector<1x16xf32> to vector<8x16xf32>
    %14 = arith.addf %11, %13 : vector<8x16xf32>
    %15 = math.tanh %14 : vector<8x16xf32>
    %cst_14 = arith.constant 5.000000e-01 : f32
    %16 = vector.broadcast %cst_14 : f32 to vector<8x16xf32>
    %17 = arith.mulf %16, %15 : vector<8x16xf32>
    %cst_15 = arith.constant 5.000000e-01 : f32
    %18 = vector.broadcast %cst_15 : f32 to vector<8x16xf32>
    %19 = arith.addf %17, %18 : vector<8x16xf32>
    %cst_16 = arith.constant 1.024000e+03 : f32
    %20 = vector.broadcast %cst_16 : f32 to vector<8x16xf32>
    %21 = arith.mulf %19, %20 : vector<8x16xf32>
    %22 = arith.fptosi %21 : vector<8x16xf32> to vector<8x16xi32>
    %23 = arith.sitofp %22 : vector<8x16xi32> to vector<8x16xf32>
    %cst_17 = arith.constant 1.024000e+03 : f32
    %24 = vector.broadcast %cst_17 : f32 to vector<8x16xf32>
    %25 = arith.divf %23, %24 : vector<8x16xf32>
    %cst_18 = arith.constant 2.000000e+00 : f32
    %26 = vector.broadcast %cst_18 : f32 to vector<8x16xf32>
    %27 = arith.mulf %26, %25 : vector<8x16xf32>
    %cst_19 = arith.constant 1.000000e+00 : f32
    %28 = vector.broadcast %cst_19 : f32 to vector<8x16xf32>
    %29 = arith.subf %27, %28 : vector<8x16xf32>
    %c0_20 = arith.constant 0 : index
    %c0_21 = arith.constant 0 : index
    %30 = vector.load %arg13[%c0_20, %c0_21] : memref<8x16xf32, #tpu.memory_space<vmem>>, vector<8x16xf32>
    tpu.vector_store %arg13[%c0_20, %c0_21], %29 {strides = array<i32>} : memref<8x16xf32, #tpu.memory_space<vmem>>, vector<8x16xf32>,
    %c0_22 = arith.constant 0 : index
    %c0_23 = arith.constant 0 : index
    %31 = vector.load %arg8[%c0_22, %c0_23] : memref<16x64xf32, #tpu.memory_space<vmem>>, vector<16x64xf32>
    %cst_24 = arith.constant dense<0.000000e+00> : vector<8x64xf32>
    %32 = tpu.matmul %29, %31, %cst_24 {dimension_numbers = #tpu.dot_dimension_numbers<[1], [0], [0], [1], [0, 0, 1, 1], [], []>} : vector<8x16xf32>, vector<16x64xf32>, vector<8x64xf32> -> vector<8x64xf32>
    %c0_25 = arith.constant 0 : index
    %c0_26 = arith.constant 0 : index
    %33 = vector.load %arg9[%c0_25, %c0_26] : memref<1x64xf32, #tpu.memory_space<vmem>>, vector<1x64xf32>
    %34 = vector.broadcast %33 : vector<1x64xf32> to vector<8x64xf32>
    %35 = arith.addf %32, %34 : vector<8x64xf32>
    %cst_27 = arith.constant 0.000000e+00 : f32
    %36 = vector.broadcast %cst_27 : f32 to vector<8x64xf32>
    %37 = arith.maximumf %35, %36 : vector<8x64xf32>
    %c0_28 = arith.constant 0 : index
    %c0_29 = arith.constant 0 : index
    %38 = vector.load %arg10[%c0_28, %c0_29] : memref<64x192xf32, #tpu.memory_space<vmem>>, vector<64x192xf32>
    %cst_30 = arith.constant dense<0.000000e+00> : vector<8x192xf32>
    %39 = tpu.matmul %37, %38, %cst_30 {dimension_numbers = #tpu.dot_dimension_numbers<[1], [0], [0], [1], [0, 0, 1, 1], [], []>} : vector<8x64xf32>, vector<64x192xf32>, vector<8x192xf32> -> vector<8x192xf32>
    %c0_31 = arith.constant 0 : index
    %c0_32 = arith.constant 0 : index
    %40 = vector.load %arg11[%c0_31, %c0_32] : memref<1x192xf32, #tpu.memory_space<vmem>>, vector<1x192xf32>
    %41 = vector.broadcast %40 : vector<1x192xf32> to vector<8x192xf32>
    %42 = arith.addf %39, %41 : vector<8x192xf32>
    %c0_33 = arith.constant 0 : index
    %c0_34 = arith.constant 0 : index
    %43 = vector.load %arg3[%c0_33, %c0_34] : memref<192x192xf32, #tpu.memory_space<vmem>>, vector<192x192xf32>
    %cst_35 = arith.constant dense<0.000000e+00> : vector<8x192xf32>
    %44 = tpu.matmul %42, %43, %cst_35 {dimension_numbers = #tpu.dot_dimension_numbers<[1], [0], [0], [1], [0, 0, 1, 1], [], []>} : vector<8x192xf32>, vector<192x192xf32>, vector<8x192xf32> -> vector<8x192xf32>
    %45 = math.tanh %44 : vector<8x192xf32>
    %c0_36 = arith.constant 0 : index
    %c0_37 = arith.constant 0 : index
    %46 = vector.load %arg12[%c0_36, %c0_37] : memref<8x192xf32, #tpu.memory_space<vmem>>, vector<8x192xf32>
    tpu.vector_store %arg12[%c0_36, %c0_37], %45 {strides = array<i32>} : memref<8x192xf32, #tpu.memory_space<vmem>>, vector<8x192xf32>,
    return
  }
  func.func @transform_0(%arg0: i32) -> (i32, i32) {
    %c0_i32 = arith.constant 0 : i32
    %c0_i32_0 = arith.constant 0 : i32
    return %arg0, %c0_i32 : i32, i32
  }
  func.func @transform_1(%arg0: i32) -> (i32, i32) {
    %c0_i32 = arith.constant 0 : i32
    %c0_i32_0 = arith.constant 0 : i32
    %c0_i32_1 = arith.constant 0 : i32
    return %c0_i32, %c0_i32_0 : i32, i32
  }
  func.func @transform_2(%arg0: i32) -> (i32, i32) {
    %c0_i32 = arith.constant 0 : i32
    %c0_i32_0 = arith.constant 0 : i32
    %c0_i32_1 = arith.constant 0 : i32
    return %c0_i32, %c0_i32_0 : i32, i32
  }
  func.func @transform_3(%arg0: i32) -> (i32, i32) {
    %c0_i32 = arith.constant 0 : i32
    %c0_i32_0 = arith.constant 0 : i32
    %c0_i32_1 = arith.constant 0 : i32
    return %c0_i32, %c0_i32_0 : i32, i32
  }
  func.func @transform_4(%arg0: i32) -> (i32, i32) {
    %c0_i32 = arith.constant 0 : i32
    %c0_i32_0 = arith.constant 0 : i32
    %c0_i32_1 = arith.constant 0 : i32
    return %c0_i32, %c0_i32_0 : i32, i32
  }
  func.func @transform_5(%arg0: i32) -> (i32, i32) {
    %c0_i32 = arith.constant 0 : i32
    %c0_i32_0 = arith.constant 0 : i32
    %c0_i32_1 = arith.constant 0 : i32
    return %c0_i32, %c0_i32_0 : i32, i32
  }
  func.func @transform_6(%arg0: i32) -> (i32, i32) {
    %c0_i32 = arith.constant 0 : i32
    %c0_i32_0 = arith.constant 0 : i32
    %c0_i32_1 = arith.constant 0 : i32
    return %c0_i32, %c0_i32_0 : i32, i32
  }
  func.func @transform_7(%arg0: i32) -> (i32, i32) {
    %c0_i32 = arith.constant 0 : i32
    %c0_i32_0 = arith.constant 0 : i32
    %c0_i32_1 = arith.constant 0 : i32
    return %c0_i32, %c0_i32_0 : i32, i32
  }
  func.func @transform_8(%arg0: i32) -> (i32, i32) {
    %c0_i32 = arith.constant 0 : i32
    %c0_i32_0 = arith.constant 0 : i32
    %c0_i32_1 = arith.constant 0 : i32
    return %c0_i32, %c0_i32_0 : i32, i32
  }
  func.func @transform_9(%arg0: i32) -> (i32, i32) {
    %c0_i32 = arith.constant 0 : i32
    %c0_i32_0 = arith.constant 0 : i32
    %c0_i32_1 = arith.constant 0 : i32
    return %c0_i32, %c0_i32_0 : i32, i32
  }
  func.func @transform_10(%arg0: i32) -> (i32, i32) {
    %c0_i32 = arith.constant 0 : i32
    %c0_i32_0 = arith.constant 0 : i32
    %c0_i32_1 = arith.constant 0 : i32
    return %c0_i32, %c0_i32_0 : i32, i32
  }
  func.func @transform_11(%arg0: i32) -> (i32, i32) {
    %c0_i32 = arith.constant 0 : i32
    %c0_i32_0 = arith.constant 0 : i32
    return %arg0, %c0_i32 : i32, i32
  }
  func.func @transform_12(%arg0: i32) -> (i32, i32) {
    %c0_i32 = arith.constant 0 : i32
    %c0_i32_0 = arith.constant 0 : i32
    return %arg0, %c0_i32 : i32, i32
  }
}

</mosaic_0001>

<bundles_post_ra>
// kernel: wavelet_autoencoder_forward.1
= control target key start
LH: loop header
LB: loop body
LE: loop exit
PB: predicated region body
PF: predicated region fallthrough
CT: control target
= control target key end

     0   :  { %vm91_vm0 = vcmask 523264   ;;  %s1145_s0 = inlined_call_operand.vmem [shape: f32[8,192], index: 0, kind: input, shape index: {}]   ;;  %s1146_s1 = inlined_call_operand.vmem [shape: f32[192,192], index: 1, kind: input, shape index: {}]   ;;  %s1147_s2 = inlined_call_operand.vmem [shape: f32[192,192], index: 2, kind: input, shape index: {}]   ;;  %s1148_s3 = inlined_call_operand.vmem [shape: f32[192,64], index: 3, kind: input, shape index: {}]   ;;  %s1149_s4 = inlined_call_operand.vmem [shape: f32[1,64], index: 4, kind: input, shape index: {}]   ;;  %s1150_s5 = inlined_call_operand.vmem [shape: f32[64,16], index: 5, kind: input, shape index: {}]   ;;  %s1151_s6 = inlined_call_operand.vmem [shape: f32[1,16], index: 6, kind: input, shape index: {}]   ;;  %s1152_s7 = inlined_call_operand.vmem [shape: f32[16,64], index: 7, kind: input, shape index: {}]   ;;  %s1153_s8 = inlined_call_operand.vmem [shape: f32[1,64], index: 8, kind: input, shape index: {}]   ;;  %s1154_s9 = inlined_call_operand.vmem [shape: f32[64,192], index: 9, kind: input, shape index: {}]   ;;  %s1155_s10 = inlined_call_operand.vmem [shape: f32[1,192], index: 10, kind: input, shape index: {}]   ;;  %s1156_s11 = inlined_call_operand.vmem [shape: f32[8,192], index: 11, kind: output, shape index: {0}]   ;;  %s1157_s12 = inlined_call_operand.hbm [shape: f32[8,16], index: 12, kind: output, shape index: {1}]  }
   0x1   :  { %v74_v0 = vld [vmem:[%s1146_s1 + $0xf8] sm:$0xff]  ;;  %v72_v1 = vld [vmem:[%s1146_s1 + $0xe8] sm:$0xff]  ;;  %v73_v2 = vld [vmem:[%s1146_s1 + $0xf0] sm:$0xff] }
   0x2   :  { %135 = vmatpush.msra.mxu2 %v74_v0  ;;  %v70_v3 = vld [vmem:[%s1146_s1 + $0xd8] sm:$0xff]  ;;  %95 = vmatpush.msra.mxu0 %v73_v2  ;;  %v71_v4 = vld [vmem:[%s1146_s1 + $0xe0] sm:$0xff]  ;;  %v69_v5 = vld [vmem:[%s1146_s1 + $0xd0] sm:$0xff] }
   0x3   :  { %v68_v6 = vld [vmem:[%s1146_s1 + $0xc8] sm:$0xff]  ;;  %v90_v7 = vld [vmem:[%s1146_s1 + $0x178] sm:$0xff]  ;;  %v67_v8 = vld [vmem:[%s1146_s1 + $0xc0] sm:$0xff] }
   0x4   :  { %136 = vmatpush.msra.mxu2 %v72_v1  ;;  %96 = vmatpush.msra.mxu0 %v71_v4  ;;  %v88_v9 = vld [vmem:[%s1146_s1 + $0x168] sm:$0xff]  ;;  %v66_v10 = vld [vmem:[%s1146_s1 + $0xb8] sm:$0xff]  ;;  %v65_v12 = vld [vmem:[%s1146_s1 + $0xb0] sm:$0xff] }
   0x5   :  { %163 = vmatpush.msra.mxu3 %v90_v7  ;;  %v86_v11 = vld [vmem:[%s1146_s1 + $0x158] sm:$0xff]  ;;  %v64_v13 = vld [vmem:[%s1146_s1 + $0xa8] sm:$0xff]  ;;  %v63_v15 = vld [vmem:[%s1146_s1 + $0xa0] sm:$0xff] }
   0x6   :  { %137 = vmatpush.msra.mxu2 %v70_v3  ;;  %97 = vmatpush.msra.mxu0 %v69_v5  ;;  %v84_v14 = vld [vmem:[%s1146_s1 + $0x148] sm:$0xff]  ;;  %v89_v16 = vld [vmem:[%s1146_s1 + $0x170] sm:$0xff]  ;;  %v62_v17 = vld [vmem:[%s1146_s1 + $0x98] sm:$0xff] }
   0x7   :  { %164 = vmatpush.msra.mxu3 %v88_v9  ;;  %v82_v18 = vld [vmem:[%s1146_s1 + $0x138] sm:$0xff]  ;;  %123 = vmatpush.msra.mxu1 %v89_v16  ;;  %v87_v19 = vld [vmem:[%s1146_s1 + $0x160] sm:$0xff]  ;;  %v61_v20 = vld [vmem:[%s1146_s1 + $0x90] sm:$0xff] }
   0x8   :  { %138 = vmatpush.msra.mxu2 %v68_v6  ;;  %98 = vmatpush.msra.mxu0 %v67_v8  ;;  %v85_v21 = vld [vmem:[%s1146_s1 + $0x150] sm:$0xff]  ;;  %v60_v22 = vld [vmem:[%s1146_s1 + $0x88] sm:$0xff]  ;;  %v59_v24 = vld [vmem:[%s1146_s1 + $0x80] sm:$0xff] }
   0x9   :  { %165 = vmatpush.msra.mxu3 %v86_v11  ;;  %v80_v23 = vld [vmem:[%s1146_s1 + $0x128] sm:$0xff]  ;;  %124 = vmatpush.msra.mxu1 %v87_v19  ;;  %v83_v25 = vld [vmem:[%s1146_s1 + $0x140] sm:$0xff]  ;;  %v58_v26 = vld [vmem:[%s1146_s1 + $0x78] sm:$0xff] }
   0xa   :  { %139 = vmatpush.msra.mxu2 %v66_v10  ;;  %99 = vmatpush.msra.mxu0 %v65_v12  ;;  %v78_v27 = vld [vmem:[%s1146_s1 + $0x118] sm:$0xff]  ;;  %v57_v28 = vld [vmem:[%s1146_s1 + $0x70] sm:$0xff]  ;;  %v56_v30 = vld [vmem:[%s1146_s1 + $0x68] sm:$0xff] }
   0xb   :  { %166 = vmatpush.msra.mxu3 %v84_v14  ;;  %125 = vmatpush.msra.mxu1 %v85_v21  ;;  %v81_v29 = vld [vmem:[%s1146_s1 + $0x130] sm:$0xff]  ;;  %v76_v31 = vld [vmem:[%s1146_s1 + $0x108] sm:$0xff]  ;;  %v55_v32 = vld [vmem:[%s1146_s1 + $0x60] sm:$0xff] }
   0xc   :  { %140 = vmatpush.msra.mxu2 %v64_v13  ;;  %100 = vmatpush.msra.mxu0 %v63_v15  ;;  %v42_v33 = vld [vmem:[%s1145_s0 + $0x8] sm:$0xff]  ;;  %v54_v34 = vld [vmem:[%s1146_s1 + $0x58] sm:$0xff]  ;;  %v79_v35 = vld [vmem:[%s1146_s1 + $0x120] sm:$0xff] }
   0xd   :  { %167 = vmatpush.msra.mxu3 %v82_v18  ;;  %126 = vmatpush.msra.mxu1 %v83_v25  ;;  %v53_v36 = vld [vmem:[%s1146_s1 + $0x50] sm:$0xff]  ;;  %v198_v37 = vld [vmem:[%s1148_s3 + $0xb8] sm:$0xff]  ;;  %v52_v38 = vld [vmem:[%s1146_s1 + $0x48] sm:$0xff] }
   0xe   :  { %141 = vmatpush.msra.mxu2 %v62_v17  ;;  %101 = vmatpush.msra.mxu0 %v61_v20  ;;  %v77_v39 = vld [vmem:[%s1146_s1 + $0x110] sm:$0xff]  ;;  %v50_v40 = vld [vmem:[%s1146_s1 + $0x38] sm:$0xff]  ;;  %v51_v41 = vld [vmem:[%s1146_s1 + $0x40] sm:$0xff] }
   0xf   :  { %168 = vmatpush.msra.mxu3 %v80_v23  ;;  %127 = vmatpush.msra.mxu1 %v81_v29  ;;  %v197_v42 = vld [vmem:[%s1148_s3 + $0xb0] sm:$0xff]  ;;  %v75_v44 = vld [vmem:[%s1146_s1 + $0x100] sm:$0xff] }
  0x10   :  { %142 = vmatpush.msra.mxu2 %v60_v22  ;;  %102 = vmatpush.msra.mxu0 %v59_v24  ;;  %v49_v43 = vld [vmem:[%s1146_s1 + $0x30] sm:$0xff] }
  0x11   :  { %169 = vmatpush.msra.mxu3 %v78_v27  ;;  %128 = vmatpush.msra.mxu1 %v79_v35 }
  0x12   :  { %143 = vmatpush.msra.mxu2 %v58_v26  ;;  %103 = vmatpush.msra.mxu0 %v57_v28 }
  0x13   :  { %170 = vmatpush.msra.mxu3 %v76_v31  ;;  %129 = vmatpush.msra.mxu1 %v77_v39 }
  0x14   :  { %144 = vmatpush.msra.mxu2 %v56_v30  ;;  %104 = vmatpush.msra.mxu0 %v55_v32 }
  0x15   :  { %551 = vmatmul.msk.f32.vlgmr.msra.gmra.mxu3 %vm91_vm0, %v42_v33 }
  0x16   :  { %145 = vmatpush.msra.mxu2 %v54_v34  ;;  %105 = vmatpush.msra.mxu0 %v53_v36 }
  0x17   :  { %234 = vmatpush.msrb.mxu3 %v198_v37 }
  0x18   :  { %146 = vmatpush.msra.mxu2 %v52_v38 }
  0x19   :  { %18 = vsyncpa [#allocation3], 0  ;;  %v48_v45 = vld [vmem:[%s1146_s1 + $0x28] sm:$0xff]  ;;  %106 = vmatpush.msra.mxu0 %v51_v41  ;;  %v190_v46 = vld [vmem:[%s1148_s3 + $0x78] sm:$0xff]  ;;  %235 = vmatpush.msrb.mxu3 %v197_v42  ;;  %v604_v32 = vmov 1024.0   ;;  %vm298_vm3 = vcmask 130048  }
  0x1a   :  { %147 = vmatpush.msra.mxu2 %v50_v40  ;;  %v47_v47 = vld [vmem:[%s1146_s1 + $0x20] sm:$0xff]  ;;  %130 = vmatpush.msra.mxu1 %v75_v44  ;;  %v196_v48 = vld [vmem:[%s1148_s3 + $0xa8] sm:$0xff]  ;;  %v46_v49 = vld [vmem:[%s1146_s1 + $0x18] sm:$0xff]  ;;  %570 = vrcp.f32 %v604_v32  ;;  %s605_s24 = smov [#allocation2]   ;;  %s539_s27 = sshll.u32 %s1157_s12, 4  ;;  %s540_s27 = int_to_ptr.hbm [resolvable:$true] %s539_s27 }
  0x1b   :  { %107 = vmatpush.msra.mxu0 %v49_v43  ;;  %550 = vmatmul.msk.f32.vlgmr.msra.gmra.mxu1 %vm91_vm0, %v42_v33  ;;  %v189_v50 = vld [vmem:[%s1148_s3 + $0x70] sm:$0xff]  ;;  %v195_v52 = vld [vmem:[%s1148_s3 + $0xa0] sm:$0xff]  ;;  %v44_v53 = vld [vmem:[%s1146_s1 + $0x8] sm:$0xff] }
  0x1c   :  { %148 = vmatpush.msra.mxu2 %v48_v45  ;;  %v45_v51 = vld [vmem:[%s1146_s1 + $0x10] sm:$0xff]  ;;  %206 = vmatpush.msrb.mxu1 %v190_v46  ;;  %v188_v54 = vld [vmem:[%s1148_s3 + $0x68] sm:$0xff]  ;;  %v41_v55 = vld [vmem:[%s1145_s0] sm:$0xff] }
  0x1d   :  { %108 = vmatpush.msra.mxu0 %v47_v47  ;;  %236 = vmatpush.msrb.mxu3 %v196_v48  ;;  %v43_v56 = vld [vmem:[%s1146_s1] sm:$0xff]  ;;  %v194_v58 = vld [vmem:[%s1148_s3 + $0x98] sm:$0xff]  ;;  %v193_v60 = vld [vmem:[%s1148_s3 + $0x90] sm:$0xff] }
  0x1e   :  { %149 = vmatpush.msra.mxu2 %v46_v49  ;;  %207 = vmatpush.msrb.mxu1 %v189_v50  ;;  %v187_v57 = vld [vmem:[%s1148_s3 + $0x60] sm:$0xff]  ;;  %v186_v59 = vld [vmem:[%s1148_s3 + $0x58] sm:$0xff]  ;;  %v185_v61 = vld [vmem:[%s1148_s3 + $0x50] sm:$0xff] }
  0x1f   :  { %109 = vmatpush.msra.mxu0 %v45_v51  ;;  %237 = vmatpush.msrb.mxu3 %v195_v52  ;;  %v184_v62 = vld [vmem:[%s1148_s3 + $0x48] sm:$0xff]  ;;  %v183_v63 = vld [vmem:[%s1148_s3 + $0x40] sm:$0xff]  ;;  %v182_v0 = vld [vmem:[%s1148_s3 + $0x38] sm:$0xff] }
  0x20   :  { %150 = vmatpush.msra.mxu2 %v44_v53  ;;  %208 = vmatpush.msrb.mxu1 %v188_v54  ;;  %v181_v1 = vld [vmem:[%s1148_s3 + $0x30] sm:$0xff]  ;;  %v180_v2 = vld [vmem:[%s1148_s3 + $0x28] sm:$0xff]  ;;  %v179_v3 = vld [vmem:[%s1148_s3 + $0x20] sm:$0xff]  ;;  %v571_v41 = vpop.eup %570 }
  0x21   :  { %151 = vmatmul.f32.vlgmr.msra.gmra.mxu2 %v41_v55  ;;  %110 = vmatpush.msra.mxu0 %v43_v56  ;;  %v178_v4 = vld [vmem:[%s1148_s3 + $0x18] sm:$0xff]  ;;  %v192_v5 = vld [vmem:[%s1148_s3 + $0x88] sm:$0xff]  ;;  %v177_v6 = vld [vmem:[%s1148_s3 + $0x10] sm:$0xff]  ;;  %v289_v47 = vmul.f32 1024.0, %v571_v41  ;;  %vm293_vm2 = vweird.f32 %v571_v41 }
  0x22   :  { %111 = vmatmul.f32.vlgmr.msra.gmra.mxu0 %v41_v55  ;;  %209 = vmatpush.msrb.mxu1 %v187_v57  ;;  %v191_v7 = vld [vmem:[%s1148_s3 + $0x80] sm:$0xff]  ;;  %v176_v8 = vld [vmem:[%s1148_s3 + $0x8] sm:$0xff]  ;;  %v254_v10 = vld [vmem:[%s1150_s5 + $0x38] sm:$0xff] }
  0x23   :  { %238 = vmatpush.msrb.mxu3 %v194_v58  ;;  %v175_v9 = vld [vmem:[%s1148_s3] sm:$0xff]  ;;  %270 = vmatpush.msrb.mxu0 %v254_v10  ;;  %v253_v11 = vld [vmem:[%s1150_s5 + $0x30] sm:$0xff]  ;;  %v252_v12 = vld [vmem:[%s1150_s5 + $0x28] sm:$0xff]  ;;  %v290_v48 = vsub.f32 1.0, %v289_v47 }
  0x24   :  { %210 = vmatpush.msrb.mxu1 %v186_v59  ;;  %v251_v13 = vld [vmem:[%s1150_s5 + $0x20] sm:$0xff]  ;;  %v250_v20 = vld [vmem:[%s1150_s5 + $0x18] sm:$0xff]  ;;  %v249_v21 = vld [vmem:[%s1150_s5 + $0x10] sm:$0xff] }
  0x25   :  { %239 = vmatpush.msrb.mxu3 %v193_v60  ;;  %271 = vmatpush.msrb.mxu0 %v253_v11  ;;  %v248_v22 = vld [vmem:[%s1150_s5 + $0x8] sm:$0xff]  ;;  %v247_v23 = vld [vmem:[%s1150_s5] sm:$0xff]  ;;  %v344_v34 = vld [vmem:[%s1154_s9 + $0x70] sm:$0xff]  ;;  %v291_v52 = vmul.f32 %v571_v41, %v290_v48 }
  0x26   :  { %211 = vmatpush.msrb.mxu1 %v185_v61  ;;  %v567_v24 = vld [vmem:[%s1149_s4] ss:$0 sm:$0xff]  ;;  %v301_v30 = vld [vmem:[%s1152_s7 + $0x8] sm:$0xff]  ;;  %v345_v35 = vld [vmem:[%s1154_s9 + $0x78] sm:$0xff] }
  0x27   :  { %240 = vmatpush.msrb.mxu3 %v192_v5  ;;  %272 = vmatpush.msrb.mxu0 %v252_v12  ;;  %v300_v31 = vld [vmem:[%s1152_s7] sm:$0xff]  ;;  %v343_v37 = vld [vmem:[%s1154_s9 + $0x68] sm:$0xff]  ;;  %v340_v38 = vld [vmem:[%s1154_s9 + $0x50] sm:$0xff]  ;;  %v292_v56 = vadd.f32 %v571_v41, %v291_v52 }
  0x28   :  { %212 = vmatpush.msrb.mxu1 %v184_v62  ;;  %323 = vmatpush.msrb.mxu2 %v301_v30  ;;  %v568_v33 = vld [vmem:[%s1151_s6] ss:$0 sm:$0xff]  ;;  %v341_v39 = vld [vmem:[%s1154_s9 + $0x58] sm:$0xff]  ;;  %v339_v44 = vld [vmem:[%s1154_s9 + $0x48] sm:$0xff] }
  0x29   :  { %241 = vmatpush.msrb.mxu3 %v191_v7  ;;  %273 = vmatpush.msrb.mxu0 %v251_v13  ;;  %v342_v36 = vld [vmem:[%s1154_s9 + $0x60] sm:$0xff]  ;;  %v336_v45 = vld [vmem:[%s1154_s9 + $0x30] sm:$0xff]  ;;  %v337_v46 = vld [vmem:[%s1154_s9 + $0x38] sm:$0xff]  ;;  %v294_v59 = vsel %vm293_vm2, %v571_v41, %v292_v56 }
  0x2a   :  { %213 = vmatpush.msrb.mxu1 %v183_v63  ;;  %324 = vmatpush.msrb.mxu2 %v300_v31  ;;  %v338_v43 = vld [vmem:[%s1154_s9 + $0x40] sm:$0xff]  ;;  %v331_v5 = vld [vmem:[%s1154_s9 + $0x8] sm:$0xff]  ;;  %v426_v7 = vld [vmem:[%s1147_s2 + $0xf8] sm:$0xff] }
  0x2b   :  { %274 = vmatpush.msrb.mxu0 %v250_v20  ;;  %363 = vmatpush.msra.mxu3 %v344_v34  ;;  %v421_v10 = vld [vmem:[%s1147_s2 + $0xd0] sm:$0xff]  ;;  %v422_v11 = vld [vmem:[%s1147_s2 + $0xd8] sm:$0xff]  ;;  %v419_v12 = vld [vmem:[%s1147_s2 + $0xc0] sm:$0xff] }
  0x2c   :  { %214 = vmatpush.msrb.mxu1 %v182_v0  ;;  %383 = vmatpush.msra.mxu2 %v345_v35  ;;  %v334_v0 = vld [vmem:[%s1154_s9 + $0x20] sm:$0xff]  ;;  %v420_v13 = vld [vmem:[%s1147_s2 + $0xc8] sm:$0xff]  ;;  %v434_v31 = vld [vmem:[%s1147_s2 + $0x138] sm:$0xff] }
  0x2d   :  { %275 = vmatpush.msrb.mxu0 %v249_v21  ;;  %364 = vmatpush.msra.mxu3 %v342_v36  ;;  %v415_v20 = vld [vmem:[%s1147_s2 + $0xa0] sm:$0xff]  ;;  %v416_v21 = vld [vmem:[%s1147_s2 + $0xa8] sm:$0xff]  ;;  %v410_v34 = vld [vmem:[%s1147_s2 + $0x78] sm:$0xff] }
  0x2e   :  { %215 = vmatpush.msrb.mxu1 %v181_v1  ;;  %384 = vmatpush.msra.mxu2 %v343_v37  ;;  %v335_v1 = vld [vmem:[%s1154_s9 + $0x28] sm:$0xff]  ;;  %v431_v32 = vld [vmem:[%s1147_s2 + $0x120] sm:$0xff]  ;;  %v398_v52 = vld [vmem:[%s1147_s2 + $0x18] sm:$0xff] }
  0x2f   :  { %276 = vmatpush.msrb.mxu0 %v248_v22  ;;  %365 = vmatpush.msra.mxu3 %v340_v38  ;;  %v437_v22 = vld [vmem:[%s1147_s2 + $0x150] sm:$0xff]  ;;  %v412_v30 = vld [vmem:[%s1147_s2 + $0x88] sm:$0xff]  ;;  %v407_v36 = vld [vmem:[%s1147_s2 + $0x60] sm:$0xff] }
  0x30   :  { %216 = vmatpush.msrb.mxu1 %v180_v2  ;;  %385 = vmatpush.msra.mxu2 %v341_v39  ;;  %v332_v2 = vld [vmem:[%s1154_s9 + $0x10] sm:$0xff]  ;;  %v432_v35 = vld [vmem:[%s1147_s2 + $0x128] sm:$0xff]  ;;  %v406_v39 = vld [vmem:[%s1147_s2 + $0x58] sm:$0xff] }
  0x31   :  { %277 = vmatpush.msrb.mxu0 %v247_v23  ;;  %366 = vmatpush.msra.mxu3 %v338_v43  ;;  %v438_v23 = vld [vmem:[%s1147_s2 + $0x158] sm:$0xff]  ;;  %v408_v37 = vld [vmem:[%s1147_s2 + $0x68] sm:$0xff]  ;;  %v405_v38 = vld [vmem:[%s1147_s2 + $0x50] sm:$0xff] }
  0x32   :  { %217 = vmatpush.msrb.mxu1 %v179_v3  ;;  %386 = vmatpush.msra.mxu2 %v339_v44  ;;  %v333_v3 = vld [vmem:[%s1154_s9 + $0x18] sm:$0xff]  ;;  %v404_v41 = vld [vmem:[%s1147_s2 + $0x48] sm:$0xff]  ;;  %v569_v44 = vld [vmem:[%s1153_s8] ss:$0 sm:$0xff] }
  0x33   :  { %367 = vmatpush.msra.mxu3 %v336_v45  ;;  %v402_v43 = vld [vmem:[%s1147_s2 + $0x38] sm:$0xff]  ;;  %v399_v45 = vld [vmem:[%s1147_s2 + $0x20] sm:$0xff]  ;;  %v396_v56 = vld [vmem:[%s1147_s2 + $0x8] sm:$0xff] }
  0x34   :  { %218 = vmatpush.msrb.mxu1 %v178_v4  ;;  %387 = vmatpush.msra.mxu2 %v337_v46  ;;  %v330_v4 = vld [vmem:[%s1154_s9] sm:$0xff]  ;;  %v400_v46 = vld [vmem:[%s1147_s2 + $0x28] sm:$0xff] }
  0x35   :  { %368 = vmatpush.msra.mxu3 %v334_v0 }
  0x36   :  { %219 = vmatpush.msrb.mxu1 %v177_v6  ;;  %388 = vmatpush.msra.mxu2 %v335_v1  ;;  %v425_v6 = vld [vmem:[%s1147_s2 + $0xf0] sm:$0xff] }
  0x37   :  { %369 = vmatpush.msra.mxu3 %v332_v2  ;;  %446 = vmatpush.msra.mxu0 %v425_v6 }
  0x38   :  { %220 = vmatpush.msrb.mxu1 %v176_v8  ;;  %389 = vmatpush.msra.mxu2 %v333_v3  ;;  %v423_v8 = vld [vmem:[%s1147_s2 + $0xe0] sm:$0xff] }
  0x39   :  { %370 = vmatpush.msra.mxu3 %v330_v4  ;;  %447 = vmatpush.msra.mxu0 %v423_v8 }
  0x3a   :  { %221 = vmatpush.msrb.mxu1 %v175_v9  ;;  %390 = vmatpush.msra.mxu2 %v331_v5  ;;  %v424_v9 = vld [vmem:[%s1147_s2 + $0xe8] sm:$0xff] }
  0x3b   :  { %448 = vmatpush.msra.mxu0 %v421_v10 }
  0x3d   :  { %449 = vmatpush.msra.mxu0 %v419_v12 }
  0x98   :  { %v132_v14 = vpop.f32.mrf.mxu1  ;;  %v172_v17 = vpop.f32.mrf.mxu3 }
  0x9f   :  { %v112_v15 = vpop.f32.mrf.mxu0 }
  0xa0   :  { %v133_v16 = vadd.f32 %v132_v14, %v112_v15  ;;  %v441_v14 = vld [vmem:[%s1147_s2 + $0x170] sm:$0xff] }
  0xa1   :  { %v417_v15 = vld [vmem:[%s1147_s2 + $0xb0] sm:$0xff]  ;;  %474 = vmatpush.msra.mxu1 %v441_v14 }
  0xa2   :  { %222 = vmatmul.f32.vlgmr.msrb.gmra.mxu1 %v133_v16  ;;  %v418_v16 = vld [vmem:[%s1147_s2 + $0xb8] sm:$0xff]  ;;  %450 = vmatpush.msra.mxu0 %v417_v15 }
  0xa4   :  { %v152_v18 = vpop.f32.mrf.mxu2  ;;  %451 = vmatpush.msra.mxu0 %v415_v20 }
  0xa5   :  { %v173_v19 = vadd.f32 %v172_v17, %v152_v18  ;;  %v442_v17 = vld [vmem:[%s1147_s2 + $0x178] sm:$0xff]  ;;  %v439_v18 = vld [vmem:[%s1147_s2 + $0x160] sm:$0xff] }
  0xa6   :  { %475 = vmatpush.msra.mxu1 %v439_v18 }
  0xa7   :  { %552 = vmatmul.msk.f32.vlgmr.msrb.gmra.mxu3 %vm91_vm0, %v173_v19  ;;  %v440_v19 = vld [vmem:[%s1147_s2 + $0x168] sm:$0xff] }
  0xa8   :  { %486 = vmatpush.msrb.mxu3 %v426_v7  ;;  %476 = vmatpush.msra.mxu1 %v437_v22 }
  0xaa   :  { %487 = vmatpush.msrb.mxu3 %v424_v9 }
  0xac   :  { %488 = vmatpush.msrb.mxu3 %v422_v11 }
  0xae   :  { %489 = vmatpush.msrb.mxu3 %v420_v13 }
  0xb0   :  { %490 = vmatpush.msrb.mxu3 %v418_v16 }
  0xb2   :  { %491 = vmatpush.msrb.mxu3 %v416_v21 }
 0x11f   :  { %v223_v25 = vpop.f32.mrf.mxu1 }
 0x120   :  { %v224_v26 = vadd.f32 %v567_v24, %v223_v25  ;;  %v435_v24 = vld [vmem:[%s1147_s2 + $0x140] sm:$0xff]  ;;  %v413_v25 = vld [vmem:[%s1147_s2 + $0x90] sm:$0xff] }
 0x121   :  { %477 = vmatpush.msra.mxu1 %v435_v24  ;;  %452 = vmatpush.msra.mxu0 %v413_v25 }
 0x12a   :  { %v243_v27 = vpop.f32.mrf.mxu3 }
 0x12b   :  { %v244_v28 = vadd.f32 %v243_v27, %v224_v26  ;;  %v414_v26 = vld [vmem:[%s1147_s2 + $0x98] sm:$0xff]  ;;  %v436_v27 = vld [vmem:[%s1147_s2 + $0x148] sm:$0xff] }
 0x12c   :  { %492 = vmatpush.msrb.mxu3 %v414_v26 }
 0x12d   :  { %v246_v29 = vmax.f32 %v244_v28, 0.0  ;;  %v433_v28 = vld [vmem:[%s1147_s2 + $0x130] sm:$0xff] }
 0x12e   :  { %478 = vmatpush.msra.mxu1 %v433_v28  ;;  %493 = vmatpush.msrb.mxu3 %v412_v30 }
 0x12f   :  { %553 = vmatmul.msk.f32.vlgmr.msrb.gmra.mxu0 %vm91_vm0, %v246_v29  ;;  %v411_v29 = vld [vmem:[%s1147_s2 + $0x80] sm:$0xff] }
 0x130   :  { %453 = vmatpush.msra.mxu0 %v411_v29  ;;  %479 = vmatpush.msra.mxu1 %v431_v32 }
 0x131   :  { %494 = vmatpush.msrb.mxu3 %v410_v34 }
 0x133   :  { %495 = vmatpush.msrb.mxu3 %v408_v37 }
 0x135   :  { %496 = vmatpush.msrb.mxu3 %v406_v39 }
 0x137   :  { %497 = vmatpush.msrb.mxu3 %v404_v41 }
 0x139   :  { %498 = vmatpush.msrb.mxu3 %v402_v43 }
 0x13b   :  { %499 = vmatpush.msrb.mxu3 %v400_v46 }
 0x13d   :  { %500 = vmatpush.msrb.mxu3 %v398_v52 }
 0x13f   :  { %501 = vmatpush.msrb.mxu3 %v396_v56 }
 0x1ac   :  { %v279_v40 = vpop.f32.mrf.mxu0 }
 0x1ad   :  { %v280_v42 = vadd.f32 %v568_v33, %v279_v40  ;;  %v409_v33 = vld [vmem:[%s1147_s2 + $0x70] sm:$0xff]  ;;  %v403_v40 = vld [vmem:[%s1147_s2 + $0x40] sm:$0xff] }
 0x1ae   :  { %454 = vmatpush.msra.mxu0 %v409_v33 }
 0x1af   :  { %572 = vtanh.f32 %v280_v42  ;;  %v401_v42 = vld [vmem:[%s1147_s2 + $0x30] sm:$0xff] }
 0x1b0   :  { %455 = vmatpush.msra.mxu0 %v407_v36 }
 0x1b2   :  { %456 = vmatpush.msra.mxu0 %v405_v38 }
 0x1b4   :  { %457 = vmatpush.msra.mxu0 %v403_v40 }
 0x1b5   :  { %v573_v49 = vpop.eup %572 }
 0x1b6   :  { %v283_v50 = vmul.f32 0.5, %v573_v49  ;;  %458 = vmatpush.msra.mxu0 %v401_v42 }
 0x1b8   :  { %v284_v51 = vadd.f32 0.5, %v283_v50  ;;  %459 = vmatpush.msra.mxu0 %v399_v45  ;;  %v397_v50 = vld [vmem:[%s1147_s2 + $0x10] sm:$0xff] }
 0x1ba   :  { %v285_v53 = vmul.f32 1024.0, %v284_v51  ;;  %v429_v51 = vld [vmem:[%s1147_s2 + $0x110] sm:$0xff]  ;;  %460 = vmatpush.msra.mxu0 %v397_v50 }
 0x1bb   :  { %480 = vmatpush.msra.mxu1 %v429_v51 }
 0x1bc   :  { %vm560_vm1 = vcmp.lt.s32.totalorder %v285_v53, 0  ;;  %v561_v54 = vceil.f32 %v285_v53  ;;  %v562_v55 = vfloor.f32 %v285_v53  ;;  %v430_v53 = vld [vmem:[%s1147_s2 + $0x118] sm:$0xff] }
 0x1be   :  { %v563_v57 = vsel %vm560_vm1, %v561_v54, %v562_v55  ;;  %v395_v54 = vld [vmem:[%s1147_s2] sm:$0xff] }
 0x1bf   :  { %v564_v58 = vcvt.f32.s32 %v563_v57  ;;  %v427_v55 = vld [vmem:[%s1147_s2 + $0x100] sm:$0xff]  ;;  %461 = vmatpush.msra.mxu0 %v395_v54  ;;  %v428_v57 = vld [vmem:[%s1147_s2 + $0x108] sm:$0xff]  ;;  %s537_s2 = sshll.u32 %s605_s24, 4  ;;  %s538_s2 = int_to_ptr.vmem [resolvable:$true] %s537_s2 }
 0x1c0   :  { %481 = vmatpush.msra.mxu1 %v427_v55 }
 0x1c1   :  { %v287_v60 = vcvt.s32.f32 %v564_v58  ;;  %v346_v58 = vld [vmem:[%s1155_s10] sm:$0x3] }
 0x1c3   :  { %v295_v61 = vmul.f32 %v294_v59, %v287_v60  ;;  %v348_v59 = vperm.slane %v346_v58, 0  ;;  %v349_v60 = vperm.slane %v346_v58, 1 }
 0x1c5   :  { %v296_v62 = vmul.f32 2.0, %v295_v61 }
 0x1c7   :  { %v554_v63 = vadd.f32 -1.0, %v296_v62 }
 0x1c9   :  { %555 = vmatmul.msk.f32.vlgmr.msrb.gmra.mxu2 %vm298_vm3, %v554_v63  ;;  %299 = vst.msk [vmem:[#allocation2] sm:$0xff] %vm298_vm3, %v554_v63 }
 0x1ca   :  { %514 = vmatpush.msrb.mxu2 %v442_v17  ;;  %542 = dma.vmem_to_hbm [thread:$0]  %s538_s2, 128, %s540_s27, [#allocation3]  }
 0x1cc   :  { %515 = vmatpush.msrb.mxu2 %v440_v19 }
 0x1ce   :  { %516 = vmatpush.msrb.mxu2 %v438_v23 }
 0x1d0   :  { %517 = vmatpush.msrb.mxu2 %v436_v27 }
 0x1d2   :  { %518 = vmatpush.msrb.mxu2 %v434_v31 }
 0x1d4   :  { %519 = vmatpush.msrb.mxu2 %v432_v35 }
 0x1d6   :  { %520 = vmatpush.msrb.mxu2 %v430_v53 }
 0x1d8   :  { %521 = vmatpush.msrb.mxu2 %v428_v57 }
 0x24c   :  { %v326_v47 = vpop.f32.mrf.mxu2 }
 0x24d   :  { %v327_v48 = vadd.f32 %v569_v44, %v326_v47 }
 0x24f   :  { %v329_v49 = vmax.f32 %v327_v48, 0.0 }
 0x251   :  { %556 = vmatmul.msk.f32.vlgmr.msra.gmra.mxu3 %vm91_vm0, %v329_v49  ;;  %557 = vmatmul.msk.f32.vlgmr.msra.gmra.mxu2 %vm91_vm0, %v329_v49 }
 0x2d4   :  { %v372_v61 = vpop.f32.mrf.mxu3  ;;  %v392_v62 = vpop.f32.mrf.mxu2 }
 0x2d5   :  { %v373_v63 = vadd.f32 %v372_v61, %v348_v59  ;;  %v393_v0 = vadd.f32 %v392_v62, %v349_v60 }
 0x2d7   :  { %462 = vmatmul.f32.vlgmr.msra.gmra.mxu0 %v373_v63  ;;  %558 = vmatmul.msk.f32.vlgmr.msra.gmra.mxu1 %vm91_vm0, %v393_v0 }
 0x2d8   :  { %502 = vmatmul.f32.vlgmr.msrb.gmra.mxu3 %v373_v63  ;;  %559 = vmatmul.msk.f32.vlgmr.msrb.gmra.mxu2 %vm91_vm0, %v393_v0 }
 0x354   :  { %v463_v1 = vpop.f32.mrf.mxu0  ;;  %v483_v2 = vpop.f32.mrf.mxu1 }
 0x355   :  { %v484_v3 = vadd.f32 %v483_v2, %v463_v1 }
 0x357   :  { %574 = vtanh.f32 %v484_v3 }
 0x35b   :  { %v503_v4 = vpop.f32.mrf.mxu3  ;;  %v523_v5 = vpop.f32.mrf.mxu2 }
 0x35c   :  { %v524_v6 = vadd.f32 %v523_v5, %v503_v4 }
 0x35d   :  { %v575_v7 = vpop.eup %574 }
 0x35e   :  { %528 = vst [vmem:[%s1156_s11] sm:$0xff] %v575_v7  ;;  %576 = vtanh.f32 %v524_v6 }
 0x364   :  { %v577_v8 = vpop.eup %576 }
 0x365   :  { %529 = vst.msk [vmem:[%s1156_s11 + $0x8] sm:$0xff] %vm91_vm0, %v577_v8 }
 0x366   :  { %602 = dma.done.wait [#allocation3], 128  }
 0x367   :  { %603 = vsyncadd [#allocation3], 4294967168 }
 0x368   :  { %549 = vsyncpa [#allocation3], 1 }

</bundles_post_ra>
